<compile_context>
chip_gen: v7x
topology: tpu7x:2x2x1
jax: 0.10.0
libtpu: 0.0.40
codegen_flags: <defaults>
</compile_context>

<pallas_src>
import numpy as np
import jax
import jax.numpy as jnp
from jax.experimental import pallas as pl
from jax.experimental.pallas import tpu as pltpu

_MIB = 1024 * 1024


def _sublane_pack(dtype):
    """Rows per packed sublane group: 8 for f32, 16 for bf16/f16, 32 for int8."""
    return max(8, 32 // jnp.dtype(dtype).itemsize)


def _hw_constants():
    """(target_block_bytes, vmem_limit_bytes, vmem_physical_bytes) per TPU gen."""
    target_block, vmem_limit, vmem_phys = 4 * _MIB, 32 * _MIB, 128 * _MIB
    try:
        vmem_phys = int(pltpu.get_tpu_info().vmem_capacity_bytes)
        if vmem_phys <= 64 * _MIB:
            # v7x: 64 MiB VMEM but ~3.2 TB/s HBM -> bigger blocks amortize the
            # fixed per-grid-step cost; in+out double-buffered = 32 MiB < 48 MiB.
            target_block, vmem_limit = 8 * _MIB, 48 * _MIB
    except Exception:
        pass  # conservative v5e/v6e defaults
    return target_block, vmem_limit, vmem_phys


def _choose_row_tile(rows, row_bytes, pack, budget_bytes):
    """Row tile for the (rows, H*W) lane-dense view.

    Legal tiles are multiples of 8 (sublane) or the full `rows`.  Prefers
    multiples of the dtype sublane packing, tiles that divide `rows` evenly
    (no masked remainder block, balanced sharding) and >= 2 grid steps so both
    v7x TensorCores get work.
    """
    cap = min(rows, max(1, budget_bytes // max(row_bytes, 1)))
    if rows <= 8 or (rows <= pack and rows <= cap):
        return rows                               # single small block
    if cap >= rows:
        # Whole tensor fits in one block: still split so v7x's 2 cores share.
        cap = min(rows, max(pack, (((rows + 1) // 2 + pack - 1) // pack) * pack))

    def _best(step):
        top = (cap // step) * step
        if top <= 0:
            return None
        for rt in range(top, 0, -step):           # prefer an even divisor
            if rows % rt == 0:
                return rt
        return top

    rt = _best(pack) or _best(8)
    return rt if rt is not None else 8


# ---------------------------------------------------------------------------
# Lane-dense kernel: (B*C, H*W) flat view, dynamic roll of the lane axis.
# ---------------------------------------------------------------------------
def _roll_lane_kernel(shift_ref, x_ref, o_ref):
    # shift_ref: SMEM scalar-prefetch (1,) int32; value = (steps % H) * W.
    # x_ref / o_ref: (row_tile, H*W) VMEM blocks (lane-dense last dim).
    # Keep the body to the single XLU rotate -- any extra elementwise work
    # would eat the lone vst slot on v5e; the rotate hides under the DMAs.
    o_ref[...] = pltpu.roll(x_ref[...], shift_ref[0], axis=1)


def _roll_lane_dense(img, steps, *, target_block, vmem_limit, donate):
    B, C, H, W = img.shape
    rows, hw = B * C, H * W
    itemsize = jnp.dtype(img.dtype).itemsize
    x2 = img.reshape(rows, hw)                    # free: collapses contiguous dims
    flat_shift = (steps % H) * W                  # roll by s along H == s*W flat
    rt = _choose_row_tile(rows, hw * itemsize, _sublane_pack(img.dtype),
                          target_block)

    grid_spec = pltpu.PrefetchScalarGridSpec(
        num_scalar_prefetch=1,
        grid=(pl.cdiv(rows, rt),),
        in_specs=[pl.BlockSpec((rt, hw), lambda i, s: (i, 0))],
        out_specs=pl.BlockSpec((rt, hw), lambda i, s: (i, 0)),
    )
    out2 = pl.pallas_call(
        _roll_lane_kernel,
        out_shape=jax.ShapeDtypeStruct((rows, hw), img.dtype),
        grid_spec=grid_spec,
        compiler_params=pltpu.CompilerParams(
            dimension_semantics=("parallel",),
            vmem_limit_bytes=vmem_limit),
        cost_estimate=pl.CostEstimate(flops=0, transcendentals=0,
                                      bytes_accessed=2 * rows * hw * itemsize),
        # Alias indices count every pallas_call operand, including the
        # scalar-prefetch arg: operand 0 = flat_shift, operand 1 = x2.
        input_output_aliases=({1: 0} if donate else {}),
    )(flat_shift, x2)
    return out2.reshape(B, C, H, W)


# ---------------------------------------------------------------------------
# Plane-batched kernel: several whole (H, W) planes per block, sublane roll.
# Used for large planes (lane-dense minimum block would blow VMEM) and as the
# fallback for Mosaic builds without dynamic lane rotation.
# ---------------------------------------------------------------------------
def _roll_plane_batched(img, steps, *, target_block, vmem_limit, vmem_phys,
                        donate):
    B, C, H, W = img.shape
    planes = B * C
    itemsize = jnp.dtype(img.dtype).itemsize
    plane_bytes = H * W * itemsize
    x3 = img.reshape(planes, H, W)
    shift = steps % H                             # hoisted, non-negative

    tile = max(1, min(planes, target_block // max(plane_bytes, 1), 32))
    if tile >= planes and planes > 1:
        tile = (planes + 1) // 2                  # >= 2 grid steps for v7x
    while tile > 1 and planes % tile != 0:        # even grid, no remainder
        tile -= 1
    block_bytes = tile * plane_bytes
    # in + out, double-buffered, plus headroom; capped at physical VMEM.
    limit = max(vmem_limit, min(4 * block_bytes + 2 * _MIB, vmem_phys))
    # TODO(synk): a single plane larger than ~VMEM/4 would need a lane-tiled
    # two-copy formulation (wrap folded into the index_map); not implemented.

    def kernel(shift_ref, x_ref, o_ref):
        s = shift_ref[0]
        for p in range(tile):                     # unrolled at trace time
            o_ref[p] = pltpu.roll(x_ref[p], s, axis=0)

    grid_spec = pltpu.PrefetchScalarGridSpec(
        num_scalar_prefetch=1,
        grid=(pl.cdiv(planes, tile),),
        in_specs=[pl.BlockSpec((tile, H, W), lambda i, s: (i, 0, 0))],
        out_specs=pl.BlockSpec((tile, H, W), lambda i, s: (i, 0, 0)),
    )
    out3 = pl.pallas_call(
        kernel,
        out_shape=jax.ShapeDtypeStruct((planes, H, W), img.dtype),
        grid_spec=grid_spec,
        compiler_params=pltpu.CompilerParams(
            dimension_semantics=("parallel",),
            vmem_limit_bytes=limit),
        cost_estimate=pl.CostEstimate(flops=0, transcendentals=0,
                                      bytes_accessed=2 * planes * plane_bytes),
        input_output_aliases=({1: 0} if donate else {}),
    )(shift, x3)
    return out3.reshape(B, C, H, W)


# ---------------------------------------------------------------------------
# Public wrapper (matches RandomVerticalRoll.forward; layout NCHW).
# ---------------------------------------------------------------------------
def random_vertical_roll(img, key, *, donate=False, force_plane_batched=False):
    """Roll `img` (NCHW) along H by a random amount drawn from [-W//2, W//2).

    Returns (rolled image, steps) so the applied shift is observable.
    """
    if img.ndim != 4:
        raise ValueError("expected NCHW input")
    B, C, H, W = img.shape
    half = W // 2
    if half > 0:
        steps = jax.random.randint(key, (1,), minval=-half, maxval=half,
                                   dtype=jnp.int32)
    else:
        # torch.randint(low=0, high=0) would be invalid; treat W < 2 as a no-op.
        steps = jnp.zeros((1,), dtype=jnp.int32)

    target_block, vmem_limit, vmem_phys = _hw_constants()
    row_bytes = H * W * jnp.dtype(img.dtype).itemsize
    # Lane-dense needs its smallest legal block (<=8 rows x H*W) to fit budget.
    lane_dense_ok = (min(B * C, 8) * row_bytes <= target_block
                     and not force_plane_batched)
    if lane_dense_ok:
        out = _roll_lane_dense(img, steps, target_block=target_block,
                               vmem_limit=vmem_limit, donate=donate)
    else:
        out = _roll_plane_batched(img, steps, target_block=target_block,
                                  vmem_limit=vmem_limit, vmem_phys=vmem_phys,
                                  donate=donate)
    return out, steps


if __name__ == "__main__":
    key = jax.random.PRNGKey(0)
    k_img, k_steps = jax.random.split(key)

    B, C, H, W = 2, 4, 16, 16
    img = jax.random.normal(k_img, (B, C, H, W), dtype=jnp.float32)

    try:
        out, steps = random_vertical_roll(img, k_steps)
        out = jax.block_until_ready(out)
    except Exception:
        # Mosaic build without dynamic lane rotation: use the plane-batched
        # sublane-roll path instead.
        out, steps = random_vertical_roll(img, k_steps, force_plane_batched=True)
        out = jax.block_until_ready(out)

    # Reference check (same semantics as torch.roll along dims=-2).
    ref = jnp.roll(img, int(steps[0]), axis=-2)
    np.testing.assert_allclose(np.asarray(out), np.asarray(ref), rtol=0, atol=0)

    print("KERNEL_OK")
</pallas_src>

<mosaic_0001>
module attributes {stable_mosaic.version = 11 : i64} {
  func.func @_roll_lane_kernel(%arg0: i32, %arg1: memref<1xi32, #tpu.memory_space<smem>>, %arg2: memref<8x256xf32, #tpu.memory_space<vmem>>, %arg3: memref<8x256xf32, #tpu.memory_space<vmem>>) attributes {dimension_semantics = [#tpu.dimension_semantics<parallel>], iteration_bounds = array<i64: 1>, scalar_prefetch = 1 : i64, scratch_operands = 0 : i64, tpu.core_type = #tpu.core_type<tc>, window_params = [{transform_indices = @transform_0, window_bounds = array<i64: 8, 256>}, {transform_indices = @transform_1, window_bounds = array<i64: 8, 256>}]} {
    %c0 = arith.constant 0 : index
    %c0_0 = arith.constant 0 : index
    %0 = vector.load %arg2[%c0, %c0_0] : memref<8x256xf32, #tpu.memory_space<vmem>>, vector<8x256xf32>
    %c0_1 = arith.constant 0 : index
    %1 = memref.load %arg1[%c0_1] : memref<1xi32, #tpu.memory_space<smem>>
    %2 = tpu.dynamic_rotate %0 by %1 dim 1 : vector<8x256xf32>, i32 -> vector<8x256xf32>
    %c0_2 = arith.constant 0 : index
    %c0_3 = arith.constant 0 : index
    %3 = vector.load %arg3[%c0_2, %c0_3] : memref<8x256xf32, #tpu.memory_space<vmem>>, vector<8x256xf32>
    tpu.vector_store %arg3[%c0_2, %c0_3], %2 {strides = array<i32>} : memref<8x256xf32, #tpu.memory_space<vmem>>, vector<8x256xf32>,
    return
  }
  func.func @transform_0(%arg0: i32, %arg1: memref<1xi32, #tpu.memory_space<smem>>) -> (i32, i32) {
    %c0_i32 = arith.constant 0 : i32
    %c0_i32_0 = arith.constant 0 : i32
    return %arg0, %c0_i32 : i32, i32
  }
  func.func @transform_1(%arg0: i32, %arg1: memref<1xi32, #tpu.memory_space<smem>>) -> (i32, i32) {
    %c0_i32 = arith.constant 0 : i32
    %c0_i32_0 = arith.constant 0 : i32
    return %arg0, %c0_i32 : i32, i32
  }
}

module attributes {stable_mosaic.version = 11 : i64} {
  func.func @kernel(%arg0: i32, %arg1: memref<1xi32, #tpu.memory_space<smem>>, %arg2: memref<4x16x16xf32, #tpu.memory_space<vmem>>, %arg3: memref<4x16x16xf32, #tpu.memory_space<vmem>>) attributes {dimension_semantics = [#tpu.dimension_semantics<parallel>], iteration_bounds = array<i64: 2>, scalar_prefetch = 1 : i64, scratch_operands = 0 : i64, tpu.core_type = #tpu.core_type<tc>, window_params = [{transform_indices = @transform_0, window_bounds = array<i64: 4, 16, 16>}, {transform_indices = @transform_1, window_bounds = array<i64: 4, 16, 16>}]} {
    %c0 = arith.constant 0 : index
    %0 = memref.load %arg1[%c0] : memref<1xi32, #tpu.memory_space<smem>>
    %c0_0 = arith.constant 0 : index
    %c0_1 = arith.constant 0 : index
    %c0_2 = arith.constant 0 : index
    %1 = vector.load %arg2[%c0_0, %c0_1, %c0_2] : memref<4x16x16xf32, #tpu.memory_space<vmem>>, vector<1x16x16xf32>
    %2 = vector.shape_cast %1 : vector<1x16x16xf32> to vector<16x16xf32>
    %3 = tpu.dynamic_rotate %2 by %0 dim 0 : vector<16x16xf32>, i32 -> vector<16x16xf32>
    %c0_3 = arith.constant 0 : index
    %c0_4 = arith.constant 0 : index
    %c0_5 = arith.constant 0 : index
    %4 = vector.load %arg3[%c0_3, %c0_4, %c0_5] : memref<4x16x16xf32, #tpu.memory_space<vmem>>, vector<1x16x16xf32>
    %5 = vector.shape_cast %4 : vector<1x16x16xf32> to vector<16x16xf32>
    %6 = vector.shape_cast %3 : vector<16x16xf32> to vector<1x16x16xf32>
    tpu.vector_store %arg3[%c0_3, %c0_4, %c0_5], %6 {strides = array<i32>} : memref<4x16x16xf32, #tpu.memory_space<vmem>>, vector<1x16x16xf32>,
    %c1 = arith.constant 1 : index
    %c0_6 = arith.constant 0 : index
    %c0_7 = arith.constant 0 : index
    %7 = vector.load %arg2[%c1, %c0_6, %c0_7] : memref<4x16x16xf32, #tpu.memory_space<vmem>>, vector<1x16x16xf32>
    %8 = vector.shape_cast %7 : vector<1x16x16xf32> to vector<16x16xf32>
    %9 = tpu.dynamic_rotate %8 by %0 dim 0 : vector<16x16xf32>, i32 -> vector<16x16xf32>
    %c1_8 = arith.constant 1 : index
    %c0_9 = arith.constant 0 : index
    %c0_10 = arith.constant 0 : index
    %10 = vector.load %arg3[%c1_8, %c0_9, %c0_10] : memref<4x16x16xf32, #tpu.memory_space<vmem>>, vector<1x16x16xf32>
    %11 = vector.shape_cast %10 : vector<1x16x16xf32> to vector<16x16xf32>
    %12 = vector.shape_cast %9 : vector<16x16xf32> to vector<1x16x16xf32>
    tpu.vector_store %arg3[%c1_8, %c0_9, %c0_10], %12 {strides = array<i32>} : memref<4x16x16xf32, #tpu.memory_space<vmem>>, vector<1x16x16xf32>,
    %c2 = arith.constant 2 : index
    %c0_11 = arith.constant 0 : index
    %c0_12 = arith.constant 0 : index
    %13 = vector.load %arg2[%c2, %c0_11, %c0_12] : memref<4x16x16xf32, #tpu.memory_space<vmem>>, vector<1x16x16xf32>
    %14 = vector.shape_cast %13 : vector<1x16x16xf32> to vector<16x16xf32>
    %15 = tpu.dynamic_rotate %14 by %0 dim 0 : vector<16x16xf32>, i32 -> vector<16x16xf32>
    %c2_13 = arith.constant 2 : index
    %c0_14 = arith.constant 0 : index
    %c0_15 = arith.constant 0 : index
    %16 = vector.load %arg3[%c2_13, %c0_14, %c0_15] : memref<4x16x16xf32, #tpu.memory_space<vmem>>, vector<1x16x16xf32>
    %17 = vector.shape_cast %16 : vector<1x16x16xf32> to vector<16x16xf32>
    %18 = vector.shape_cast %15 : vector<16x16xf32> to vector<1x16x16xf32>
    tpu.vector_store %arg3[%c2_13, %c0_14, %c0_15], %18 {strides = array<i32>} : memref<4x16x16xf32, #tpu.memory_space<vmem>>, vector<1x16x16xf32>,
    %c3 = arith.constant 3 : index
    %c0_16 = arith.constant 0 : index
    %c0_17 = arith.constant 0 : index
    %19 = vector.load %arg2[%c3, %c0_16, %c0_17] : memref<4x16x16xf32, #tpu.memory_space<vmem>>, vector<1x16x16xf32>
    %20 = vector.shape_cast %19 : vector<1x16x16xf32> to vector<16x16xf32>
    %21 = tpu.dynamic_rotate %20 by %0 dim 0 : vector<16x16xf32>, i32 -> vector<16x16xf32>
    %c3_18 = arith.constant 3 : index
    %c0_19 = arith.constant 0 : index
    %c0_20 = arith.constant 0 : index
    %22 = vector.load %arg3[%c3_18, %c0_19, %c0_20] : memref<4x16x16xf32, #tpu.memory_space<vmem>>, vector<1x16x16xf32>
    %23 = vector.shape_cast %22 : vector<1x16x16xf32> to vector<16x16xf32>
    %24 = vector.shape_cast %21 : vector<16x16xf32> to vector<1x16x16xf32>
    tpu.vector_store %arg3[%c3_18, %c0_19, %c0_20], %24 {strides = array<i32>} : memref<4x16x16xf32, #tpu.memory_space<vmem>>, vector<1x16x16xf32>,
    return
  }
  func.func @transform_0(%arg0: i32, %arg1: memref<1xi32, #tpu.memory_space<smem>>) -> (i32, i32, i32) {
    %c0_i32 = arith.constant 0 : i32
    %c0_i32_0 = arith.constant 0 : i32
    %c0_i32_1 = arith.constant 0 : i32
    return %arg0, %c0_i32, %c0_i32_0 : i32, i32, i32
  }
  func.func @transform_1(%arg0: i32, %arg1: memref<1xi32, #tpu.memory_space<smem>>) -> (i32, i32, i32) {
    %c0_i32 = arith.constant 0 : i32
    %c0_i32_0 = arith.constant 0 : i32
    %c0_i32_1 = arith.constant 0 : i32
    return %arg0, %c0_i32, %c0_i32_0 : i32, i32, i32
  }
}

</mosaic_0001>

<bundles_post_ra>
// kernel: tpu_custom_call.1
= control target key start
LH: loop header
LB: loop body
LE: loop exit
PB: predicated region body
PF: predicated region fallthrough
CT: control target
= control target key end

     0   :  { %8 = vsyncpa [#allocation5], 0  ;;  %s155_s0 = inlined_call_operand.<no memory space> [shape: s32[1], index: 0, kind: input, shape index: {}]   ;;  %s156_s1 = inlined_call_operand.hbm [shape: f32[8,256], index: 1, kind: input, shape index: {}]   ;;  %s157_s2 = inlined_call_operand.hbm [shape: f32[8,256], index: 2, kind: output, shape index: {}]  }
   0x1   :  { %9 = vsyncpa [#allocation6], 0  ;;  %s111_s9 = smov [#allocation4]   ;;  %s63_s13 = scalar_lea.hbm %s156_s1, 256 }
   0x2   :  { %s16_s10 = sshll.u32 %s111_s9, 4  ;;  %p64_p0 = scmp.ne.s32.totalorder %s156_s1, %s63_s13  ;;  %s17_s10 = int_to_ptr.vmem [resolvable:$true] %s16_s10 }
   0x3   :  { %p67_p1 = scmp.lt.u32.totalorder %s63_s13, %s156_s1 }
   0x5   :  { %p69_p2 = pnand %p67_p1, %p64_p0 }
   0x7   :  { %72 = shalt.err (!%p69_p2)
}
   0x8   :  { %s73_s18 = scalar_lea.vmem %s17_s10, 256  ;;  %p78_p4 = scmp.lt.s32.totalorder %s17_s10, %s17_s10 }
   0x9   :  { %p74_p3 = scmp.ne.s32.totalorder %s17_s10, %s73_s18  ;;  %p79_p5 = scmp.lt.s32.totalorder %s73_s18, %s73_s18 }
   0xb   :  { %p80_p6 = por %p79_p5, %p78_p4 }
   0xd   :  { %p81_p7 = pnand %p80_p6, %p74_p3 }
   0xf   :  { %84 = shalt.err (!%p81_p7)
}
  0x10   :  { %19 = dma.hbm_to_vmem [thread:$0]  %s156_s1, 256, %s17_s10, [#allocation5]  }
  0x11   :  { %107 = dma.done.wait [#allocation5], 256  }
  0x12   :  { %108 = vsyncadd [#allocation5], 4294967040  ;;  %s26_s23 = sand.u32 255, %s155_s0   ;;  %v23_v0 = vld [vmem:[#allocation4] sm:$0xff]  ;;  %v24_v1 = vld [vmem:[#allocation4 + $0x8] sm:$0xff]  ;;  %v34_v2 = vlaneseq  ;;  %s112_s1 = smov [#allocation7]  }
  0x13   :  { %s27_s24 = sand.u32 127, %s26_s23   ;;  %s28_s25 = sshrl.u32 %s26_s23, 7 }
  0x14   :  { %29 = vrot.lane.b32.xlu0 %v23_v0, %s27_s24  ;;  %s39_s26 = sand.u32 1, %s28_s25  ;;  %v35_v3 = vand.u32 127, %v34_v2  ;;  %v33_v4 = vstv %s27_s24  ;;  %s52_s27 = sshll.u32 %s112_s1, 4  ;;  %s53_s27 = int_to_ptr.vmem [resolvable:$true] %s52_s27 }
  0x15   :  { %v40_v5 = vstv %s39_s26  ;;  %s85_s0 = scalar_lea.vmem %s53_s27, 256  ;;  %p90_p9 = scmp.lt.s32.totalorder %s53_s27, %s53_s27 }
  0x16   :  { %vm36_vm0 = vcmp.lt.s32.totalorder %v35_v3, %v33_v4  ;;  %vm41_vm1 = vcmp.ne.s32.totalorder %v40_v5, 0  ;;  %p86_p8 = scmp.ne.s32.totalorder %s53_s27, %s85_s0  ;;  %p91_p10 = scmp.lt.s32.totalorder %s85_s0, %s85_s0 }
  0x18   :  { %31 = vrot.lane.b32.xlu0 %v24_v1, %s27_s24  ;;  %p92_p11 = por %p91_p10, %p90_p9 }
  0x1a   :  { %p93_p12 = pnand %p92_p11, %p86_p8 }
  0x86   :  { %v30_v6 = vpop.permute.xlu0 %29 }
  0x8a   :  { %v32_v7 = vpop.permute.xlu0 %31 }
  0x8b   :  { %v37_v8 = vsel %vm36_vm0, %v30_v6, %v32_v7  ;;  %v38_v9 = vsel %vm36_vm0, %v32_v7, %v30_v6 }
  0x8c   :  { %v42_v10 = vsel %vm41_vm1, %v37_v8, %v38_v9  ;;  %v43_v11 = vsel %vm41_vm1, %v38_v9, %v37_v8 }
  0x8d   :  { %44 = vst [vmem:[#allocation7] sm:$0xff] %v42_v10  ;;  %45 = vst [vmem:[#allocation7 + $0x8] sm:$0xff] %v43_v11 }
  0x8e   :  { %96 = shalt.err (!%p93_p12)
}
  0x8f   :  { %s97_s30 = scalar_lea.hbm %s157_s2, 256 }
  0x90   :  { %p98_p13 = scmp.ne.s32.totalorder %s157_s2, %s97_s30  ;;  %p101_p0 = scmp.lt.u32.totalorder %s97_s30, %s157_s2 }
  0x92   :  { %p103_p1 = pnand %p101_p0, %p98_p13 }
  0x94   :  { %106 = shalt.err (!%p103_p1)
}
  0x95   :  { %55 = dma.vmem_to_hbm [thread:$0]  %s53_s27, 256, %s157_s2, [#allocation6]  }
  0x96   :  { %109 = dma.done.wait [#allocation6], 256  }
  0x97   :  { %110 = vsyncadd [#allocation6], 4294967040 }
  0x98   :  { %59 = vsyncpa [#allocation5], 1 }
  0x99   :  { %60 = vsyncpa [#allocation6], 1 }

// kernel: tpu_custom_call.1
= control target key start
LH: loop header
LB: loop body
LE: loop exit
PB: predicated region body
PF: predicated region fallthrough
CT: control target
= control target key end

     0   :  { %s708_s0 = inlined_call_operand.<no memory space> [shape: s32[1], index: 0, kind: input, shape index: {}]   ;;  %s709_s1 = inlined_call_operand.hbm [shape: f32[8,16,16], index: 1, kind: input, shape index: {}]   ;;  %s710_s2 = inlined_call_operand.hbm [shape: f32[8,16,16], index: 2, kind: output, shape index: {}]  }
   0x1   :  { %7 = sst [smem:[#allocation3]] %s708_s0 }
   0x2   :  { %8 = vsyncpa [#allocation5], 0 }
   0x3   :  { %10 = vsyncpa [#allocation5 + $0x1], 0 }
   0x4   :  { %11 = vsyncpa [#allocation6], 0 }
   0x5   :  { %13 = vsyncpa [#allocation6 + $0x1], 0  ;;  %s499_s11 = smov 0   ;;  %s501_s12 = smov 0  }
   0x6   :  { %s503_s13 = smov 0   ;;  %s505_s14 = smov 0  }
   0x7 LB: > { %s520_s0 = sadd.s32 4294967295, %s473_s14   ;;  %s295_s15 = sadd.s32 4294967294, %s473_s14   ;;  %s473_s14 = sphi %s505_s14, %s725_s14   ;;  %s469_s13 = sphi %s503_s13, %s724_s13   ;;  %s465_s12 = sphi %s501_s12, %s723_s12   ;;  %s461_s11 = sphi %s499_s11, %s722_s11  }
   0x8   : > { %s524_s16 = sadd.s32 1, %s473_s14   ;;  %s26_s17 = sadd.s32 1, %s469_s13 }
   0x9   : > { %s23_s18 = ssub.s32 %s473_s14, %s524_s16  ;;  %p33_p0 = scmp.ne.s32.totalorder %s469_s13, %s465_s12 }
   0xa   : > { %p24_p1 = scmp.eq.s32.totalorder %s23_s18, 0  ;;  %p34_p2 = scmp.eq.s32.totalorder %s473_s14, 0 }
   0xb   : > { %p39_p3 = scmp.ne.s32.totalorder %s465_s12, %s461_s11  ;;  %p40_p4 = scmp.eq.s32.totalorder %s520_s0, 0 }
   0xc   : > { %s536_s19 = scalar_select %p24_p1, %s469_s13, %s26_s17  }
   0xd   : > { %p538_p5 = por %p34_p2, %p33_p0  ;;  %p542_p6 = por %p40_p4, %p39_p3 }
   0xe   : > { %p63_p7 = scmp.eq.s32.totalorder %s520_s0, 1  ;;  %p69_p8 = scmp.eq.s32.totalorder %s295_s15, 1 }
   0xf   : > { %p339_p10 = scmp.lt.s32.totalorder %s473_s14, 2  ;;  %s89_s24 = sand.u32 1, %s469_s13  }
  0x10   : > { %p549_p11 = por %p63_p7, %p33_p0  ;;  %p553_p12 = por %p69_p8, %p39_p3 }
  0x11   : > { %s324_s25 = sshll.u32 %s473_s14, 10  ;;  %s298_s26 = sshll.u32 %s89_s24, 6 }
  0x12   : > { %s714_s22 = scalar_select %p549_p11, 1, 0 }
  0x13   : > { %s715_s23 = scalar_select %p553_p12, 1, 0 }
  0x14   : > { %s562_s29 = scalar_lea.hbm %s709_s1, %s324_s25  ;;  %s93_s30 = scalar_lea.vmem [#allocation4], %s298_s26 }
  0x15   : > { %s101_s3 = sshll.u32 %s93_s30, 4  ;;  %p566_p13 = pnand %p339_p10, %p538_p5  ;;  %s570_s3 = int_to_ptr.vmem [resolvable:$true] %s101_s3 }
  0x16   : > { %s572_s5 = scalar_lea.sflag [#allocation5], %s89_s24  ;;  %s377_s6 = scalar_lea.hbm %s562_s29, 1024 }
  0x17   : > { %p378_p0 = scmp.ne.s32.totalorder %s562_s29, %s377_s6  ;;  %p379_p1 = pneg %p566_p13 }
  0x18   : > { %s382_s9 = scalar_lea.hbm %s709_s1, 2048  ;;  %p383_p4 = scmp.lt.u32.totalorder %s562_s29, %s709_s1 }
  0x19   : > { %p380_p2 = pnand %p379_p1, %p378_p0  ;;  %p384_p5 = scmp.lt.u32.totalorder %s382_s9, %s377_s6 }
  0x1a   : > { %p386_p8 = scmp.lt.u32.totalorder %s377_s6, %s562_s29 }
  0x1b   : > { %p381_p3 = pneg %p380_p2  ;;  %p385_p7 = por %p384_p5, %p383_p4 }
  0x1d   : > { %p387_p10 = por %p386_p8, %p385_p7 }
  0x1f   : > { %p388_p9 = pnand %p387_p10, %p381_p3 }
  0x21   : > { %391 = shalt.err (!%p388_p9)
}
  0x22   : > { %s392_s17 = scalar_lea.vmem %s570_s3, 1024  ;;  %s475_s18 = smov [#allocation4]  }
  0x23   : > { %p393_p0 = scmp.ne.s32.totalorder %s570_s3, %s392_s17  ;;  %s397_s20 = sshll.u32 %s475_s18, 4  ;;  %s398_s20 = int_to_ptr.vmem [resolvable:$false] %s397_s20 }
  0x24   : > { %s399_s24 = scalar_lea.vmem %s398_s20, 2048  ;;  %p400_p11 = scmp.lt.s32.totalorder %s570_s3, %s398_s20 }
  0x25   : > { %p395_p2 = pnand %p393_p0, %p379_p1  ;;  %p401_p4 = scmp.lt.s32.totalorder %s399_s24, %s392_s17 }
  0x27   : > { %p396_p12 = pneg %p395_p2  ;;  %p402_p5 = por %p401_p4, %p400_p11 }
  0x29   : > { %p403_p7 = pnand %p402_p5, %p396_p12 }
  0x2b   : > { %406 = shalt.err (!%p403_p7)
}
  0x2c   : > { %s476_s25 = smov 128   ;;  %s477_s26 = smov 8  }
  0x2d   : > { %334 = dma.hbm_to_vmem [thread:$0]  (!%p566_p13), %s562_s29, 1024, %s570_s3, %s572_s5, %s476_s25, %s476_s25, %s477_s26  }
  0x2e   : > { %p302_p9 = scmp.ge.s32.totalorder %s473_s14, 1  ;;  %p109_p1 = scmp.lt.s32.totalorder %s473_s14, 3 }
  0x30   : > { %p110_p3 = pnand %p302_p9, %p109_p1 }
  0x31   : > { %s603_s27 = sand.u32 (!%p110_p3), 1, %s465_s12  }
  0x32   : > { %113 = sbr.rel (%p110_p3) target bundleno = 91 (0x5b), region = 24  ;;  %s303_s28 = sshll.u32 (!%p110_p3), %s603_s27, 6 }
  0x33   : > { %s116_s30 = scalar_lea.sflag (!%p110_p3), [#allocation5], %s603_s27  ;;  %s119_s6 = scalar_lea.vmem (!%p110_p3), [#allocation4], %s303_s28 }
  0x39   : > { %452 = dma.done.wait (%p542_p6), %s116_s30, 1024  }
  0x3a   : > { %454 = vsyncadd (%p542_p6), %s116_s30, 4294966272  ;;  %s140_s4 = sld [smem:[#allocation3]]  ;;  %v152_v0 = vlaneseq  ;;  %v141_v2 = vld [vmem:[%s119_s6] sm:$0xff]  ;;  %v142_v3 = vld [vmem:[%s119_s6 + $0x8] sm:$0xff]  ;;  %vm162_vm1 = vcmask 130048   ;;  %s615_s21 = scalar_lea.vmem [#allocation7], %s303_s28 }
  0x3b   : > { %v305_v4 = vld [vmem:[%s119_s6 + $0x10] sm:$0xff]  ;;  %v306_v5 = vld [vmem:[%s119_s6 + $0x18] sm:$0xff]  ;;  %v309_v7 = vld [vmem:[%s119_s6 + $0x20] sm:$0xff]  ;;  %s222_s9 = sshll.u32 %s615_s21, 4  ;;  %s326_s10 = sshll.u32 %s520_s0, 10  ;;  %s631_s9 = int_to_ptr.vmem [resolvable:$true] %s222_s9 }
  0x3c   : > { %v153_v1 = vshrl.u32 %v152_v0, 7  ;;  %v310_v8 = vld [vmem:[%s119_s6 + $0x28] sm:$0xff]  ;;  %v313_v9 = vld [vmem:[%s119_s6 + $0x30] sm:$0xff]  ;;  %v314_v13 = vld [vmem:[%s119_s6 + $0x38] sm:$0xff]  ;;  %s644_s17 = scalar_lea.hbm %s710_s2, %s326_s10  ;;  %s208_s18 = scalar_lea.sflag [#allocation6], %s603_s27 }
  0x3d   : > { %s407_s20 = scalar_lea.vmem %s631_s9, 1024  ;;  %p719_p11 = scmp.ne.s32.totalorder %s714_s22, 0 }
  0x3e   : > { %p408_p6 = scmp.ne.s32.totalorder %s631_s9, %s407_s20  ;;  %s478_s24 = smov [#allocation7]  }
  0x3f   : > { %s411_s25 = sshll.u32 %s478_s24, 4  ;;  %s412_s25 = int_to_ptr.vmem [resolvable:$false] %s411_s25 }
  0x40   : > { %s143_s29 = sand.u32 15, %s140_s4   ;;  %p409_p12 = pnand %p408_p6, %p719_p11 }
  0x41   : > { %s144_s3 = sand.u32 7, %s143_s29   ;;  %s145_s5 = sshrl.u32 %s143_s29, 3 }
  0x42   : > { %s146_s7 = ssub.s32 8, %s144_s3  ;;  %v151_v6 = vstv %s144_s3  ;;  %s157_s8 = sand.u32 1, %s145_s5 }
  0x43   : > { %v147_v10 = vstv %s146_s7  ;;  %vm611_vm0 = vcmp.lt.s32.totalorder %v153_v1, %v151_v6  ;;  %v158_v12 = vstv %s157_s8  ;;  %p410_p13 = pneg %p409_p12  ;;  %s413_s26 = scalar_lea.vmem %s412_s25, 2048 }
  0x44   : > { %v148_v14 = vrot.slane %v141_v2, %v147_v10  ;;  %v150_v15 = vrot.slane %v142_v3, %v147_v10  ;;  %vm159_vm2 = vcmp.ne.s32.totalorder %v158_v12, 0  ;;  %v169_v16 = vrot.slane %v305_v4, %v147_v10  ;;  %p414_p8 = scmp.lt.s32.totalorder %s631_s9, %s412_s25  ;;  %p415_p10 = scmp.lt.s32.totalorder %s413_s26, %s407_s20 }
  0x45   : > { %v171_v17 = vrot.slane %v306_v5, %v147_v10  ;;  %v183_v18 = vrot.slane %v309_v7, %v147_v10  ;;  %v185_v19 = vrot.slane %v310_v8, %v147_v10  ;;  %v197_v20 = vrot.slane %v313_v9, %v147_v10 }
  0x46   : > { %v155_v21 = vsel %vm611_vm0, %v148_v14, %v150_v15  ;;  %v156_v22 = vsel %vm611_vm0, %v150_v15, %v148_v14  ;;  %v199_v23 = vrot.slane %v314_v13, %v147_v10  ;;  %p416_p0 = por %p415_p10, %p414_p8 }
  0x47   : > { %v160_v24 = vsel %vm159_vm2, %v155_v21, %v156_v22  ;;  %v161_v25 = vsel %vm159_vm2, %v156_v22, %v155_v21  ;;  %v172_v26 = vsel %vm611_vm0, %v169_v16, %v171_v17  ;;  %v173_v27 = vsel %vm611_vm0, %v171_v17, %v169_v16 }
  0x48   : > { %163 = vst.msk [vmem:[%s615_s21] sm:$0xff] %vm162_vm1, %v160_v24  ;;  %164 = vst.msk [vmem:[%s615_s21 + $0x8] sm:$0xff] %vm162_vm1, %v161_v25  ;;  %v174_v28 = vsel %vm159_vm2, %v172_v26, %v173_v27  ;;  %v175_v29 = vsel %vm159_vm2, %v173_v27, %v172_v26  ;;  %v186_v30 = vsel %vm611_vm0, %v183_v18, %v185_v19  ;;  %p417_p2 = pnand %p416_p0, %p410_p13 }
  0x49   : > { %v187_v31 = vsel %vm611_vm0, %v185_v19, %v183_v18  ;;  %307 = vst.msk [vmem:[%s615_s21 + $0x10] sm:$0xff] %vm162_vm1, %v174_v28  ;;  %308 = vst.msk [vmem:[%s615_s21 + $0x18] sm:$0xff] %vm162_vm1, %v175_v29  ;;  %v200_v34 = vsel %vm611_vm0, %v197_v20, %v199_v23  ;;  %v201_v35 = vsel %vm611_vm0, %v199_v23, %v197_v20 }
  0x4a   : > { %v188_v32 = vsel %vm159_vm2, %v186_v30, %v187_v31  ;;  %v189_v33 = vsel %vm159_vm2, %v187_v31, %v186_v30  ;;  %v202_v36 = vsel %vm159_vm2, %v200_v34, %v201_v35  ;;  %v203_v37 = vsel %vm159_vm2, %v201_v35, %v200_v34 }
  0x4b   : > { %311 = vst.msk [vmem:[%s615_s21 + $0x20] sm:$0xff] %vm162_vm1, %v188_v32  ;;  %312 = vst.msk [vmem:[%s615_s21 + $0x28] sm:$0xff] %vm162_vm1, %v189_v33 }
  0x4c   : > { %315 = vst.msk [vmem:[%s615_s21 + $0x30] sm:$0xff] %vm162_vm1, %v202_v36  ;;  %316 = vst.msk [vmem:[%s615_s21 + $0x38] sm:$0xff] %vm162_vm1, %v203_v37 }
  0x4d   : > { %420 = shalt.err (!%p417_p2)
}
  0x4e   : > { %s421_s28 = scalar_lea.hbm %s644_s17, 1024  ;;  %s425_s4 = scalar_lea.hbm %s710_s2, 2048 }
  0x4f   : > { %p422_p4 = scmp.ne.s32.totalorder %s644_s17, %s421_s28  ;;  %p426_p9 = scmp.lt.u32.totalorder %s644_s17, %s710_s2 }
  0x50   : > { %p427_p1 = scmp.lt.u32.totalorder %s425_s4, %s421_s28  ;;  %p429_p6 = scmp.lt.u32.totalorder %s421_s28, %s644_s17 }
  0x51   : > { %p423_p5 = pnand %p422_p4, %p719_p11 }
  0x52   : > { %p428_p3 = por %p427_p1, %p426_p9 }
  0x53   : > { %p424_p7 = pneg %p423_p5 }
  0x54   : > { %p430_p12 = por %p429_p6, %p428_p3 }
  0x56   : > { %p431_p13 = pnand %p430_p12, %p424_p7 }
  0x58   : > { %434 = shalt.err (!%p431_p13)
}
  0x59   : > { %s479_s5 = smov 128   ;;  %s480_s7 = smov 8  }
  0x5a   : > { %329 = dma.vmem_to_hbm [thread:$0]  (%p719_p11), %s631_s9, 1024, %s644_s17, %s208_s18, %s479_s5, %s479_s5, %s480_s7  }
  0x5b PF: > { %s237_s8 = sand.u32 1, %s461_s11   ;;  %p720_p8 = scmp.ne.s32.totalorder %s715_s23, 0 }
  0x5c   : > { %p721_p10 = scmp.ge.s32.totalorder %s473_s14, 2  ;;  %s238_s21 = scalar_lea.sflag [#allocation6], %s237_s8 }
  0x5e   : > { %p336_p0 = pnand %p721_p10, %p720_p8 }
  0x60   : > { %456 = dma.done.wait (!%p336_p0), %s238_s21, 1024  }
  0x61   : > { %458 = vsyncadd (!%p336_p0), %s238_s21, 4294966272  ;;  %p16_p2 = scmp.ge.s32.totalorder %s524_s16, 4   ;;  %s722_s11 = smov %s465_s12 }
  0x62   : > { %s723_s12 = smov %s469_s13  ;;  %s724_s13 = smov %s536_s19 }
  0x63   : > { %s725_s14 = smov %s524_s16  ;;  %18 = sbr.rel (!%p16_p2) target bundleno = 7 (0x7), region = 75 }
  0x6a   :  { %243 = vsyncpa [#allocation5], 1 }
  0x6b   :  { %245 = vsyncpa [#allocation5 + $0x1], 1 }
  0x6c   :  { %246 = vsyncpa [#allocation6], 1 }
  0x6d   :  { %248 = vsyncpa [#allocation6 + $0x1], 1 }

</bundles_post_ra>
